<compile_context>
chip_gen: v7x
topology: tpu7x:2x2x1
jax: 0.10.0
libtpu: 0.0.40
codegen_flags: <defaults>
</compile_context>

<pallas_src>
import functools

import jax
import jax.numpy as jnp
from jax import lax
from jax.experimental import pallas as pl
from jax.experimental.pallas import tpu as pltpu

EPS = 1e-5          # torch GroupNorm default
LANE = 128
SUBLANE = 8
VMEM_BUDGET = 24 * 1024 * 1024   # stays under default scoped VMEM on all gens


def _round_up(n, m):
    return (n + m - 1) // m * m


def _prednet_kernel(x_ref, w1_ref, w2_ref, wo_ref, pk_ref, o_ref, *, L):
    """One (tm, Lp) row-tile of the fused MLP. L = real (unpadded) channels."""
    inv_L = 1.0 / L
    Lp = w1_ref.shape[0]
    P2p = wo_ref.shape[1]
    mxu_dtype = w1_ref.dtype

    x_in = x_ref[...].astype(jnp.float32)          # residual path, f32

    # packed per-channel vectors: rows = b1,g1,be1,b2,g2,be2,bo,(pad)
    pk = pk_ref[...].astype(jnp.float32)           # (8, W)
    b1, g1, be1 = pk[0:1, :Lp], pk[1:2, :Lp], pk[2:3, :Lp]
    b2, g2, be2 = pk[3:4, :Lp], pk[4:5, :Lp], pk[5:6, :Lp]
    bo = pk[6:7, :P2p]

    def matmul(a, w_ref, b):
        # MXU in the weight dtype (f32 or bf16), accumulate in f32.
        return jnp.dot(a.astype(mxu_dtype), w_ref[...],
                       preferred_element_type=jnp.float32) + b

    def groupnorm(h, g, b):
        # Fused stats: one pass for sum and sum-of-squares (padded lanes are
        # exactly zero, so summing over Lp and dividing by L is exact).
        s = jnp.sum(h, axis=-1, keepdims=True)
        ss = jnp.sum(h * h, axis=-1, keepdims=True)
        mean = s * inv_L
        var = jnp.maximum(ss * inv_L - mean * mean, 0.0)
        rinv = lax.rsqrt(var + EPS)
        return (h - mean) * (g * rinv) + b          # padded lanes: g=b=0 -> 0

    h = matmul(x_in, w1_ref, b1)
    h = jnp.maximum(groupnorm(h, g1, be1), 0.0)
    h = matmul(h, w2_ref, b2)
    h = jnp.maximum(groupnorm(h, g2, be2) + x_in, 0.0)
    o_ref[...] = matmul(h, wo_ref, bo).astype(o_ref.dtype)


def prediction_net(x, params, *, tm=512, mxu_dtype=None):
    """x: (N, L) float32.  params: dict of weights.  Returns (N, num_preds*2)."""
    N, L = x.shape
    P2 = params["wo"].shape[1]
    w_dtype = jnp.dtype(mxu_dtype) if mxu_dtype is not None \
        else jnp.dtype(params["w1"].dtype)

    # ---- lane-dense padding of all shapes --------------------------------
    Lp = _round_up(L, LANE)
    P2p = _round_up(P2, LANE)
    W = max(Lp, P2p)

    def pad2(a, r, c):
        return jnp.pad(a, ((0, r - a.shape[0]), (0, c - a.shape[1])))

    # (In training these padded/cast weights would be prepared once, not per call.)
    w1 = pad2(params["w1"], Lp, Lp).astype(w_dtype)
    w2 = pad2(params["w2"], Lp, Lp).astype(w_dtype)
    wo = pad2(params["wo"], Lp, P2p).astype(w_dtype)

    def pad1(v, width):
        return jnp.pad(v.astype(jnp.float32), (0, width - v.shape[0]))

    packed = jnp.stack([
        pad1(params["b1"], W), pad1(params["g1"], W), pad1(params["be1"], W),
        pad1(params["b2"], W), pad1(params["g2"], W), pad1(params["be2"], W),
        pad1(params["bo"], W), jnp.zeros((W,), jnp.float32),
    ])                                              # (8, W)

    # ---- choose the biggest row tile that fits the VMEM budget -----------
    wbytes = (w1.size + w2.size + wo.size) * w_dtype.itemsize
    resident = 2 * wbytes + 2 * packed.size * 4     # constants, double-buffered
    per_row = 2 * (Lp + P2p) * 4                    # x / out tiles, double-buffered
    tm_budget = max(SUBLANE,
                    ((VMEM_BUDGET - resident) // per_row) // SUBLANE * SUBLANE)
    tm = max(SUBLANE, min(tm, tm_budget, _round_up(N, SUBLANE)))

    # ---- ragged batch: zero-pad rows to a tile multiple ------------------
    Np = _round_up(N, tm)
    x_p = jnp.pad(x.astype(jnp.float32), ((0, Np - N), (0, Lp - L)))

    kernel = functools.partial(_prednet_kernel, L=L)
    out = pl.pallas_call(
        kernel,
        out_shape=jax.ShapeDtypeStruct((Np, P2p), x.dtype),
        grid_spec=pltpu.PrefetchScalarGridSpec(
            num_scalar_prefetch=0,
            grid=(Np // tm,),
            in_specs=[
                pl.BlockSpec((tm, Lp), lambda i: (i, 0)),    # x row tile
                pl.BlockSpec((Lp, Lp), lambda i: (0, 0)),    # w1 (resident)
                pl.BlockSpec((Lp, Lp), lambda i: (0, 0)),    # w2 (resident)
                pl.BlockSpec((Lp, P2p), lambda i: (0, 0)),   # wo (resident)
                pl.BlockSpec((8, W), lambda i: (0, 0)),      # packed biases
            ],
            out_specs=pl.BlockSpec((tm, P2p), lambda i: (i, 0)),
        ),
        compiler_params=pltpu.CompilerParams(
            dimension_semantics=("parallel",)),   # batch axis shards across TCs
    )(x_p, w1, w2, wo, packed)

    return out[:N, :P2]


# ------------------------- reference & test harness -------------------------

def _reference(x, p):
    """Plain-JAX reference matching torch semantics exactly (f32)."""
    def gn(h, g, b):
        m = jnp.mean(h, axis=-1, keepdims=True)
        v = jnp.mean((h - m) ** 2, axis=-1, keepdims=True)
        return (h - m) / jnp.sqrt(v + EPS) * g + b

    h = x @ p["w1"] + p["b1"]
    h = jax.nn.relu(gn(h, p["g1"], p["be1"]))
    h = h @ p["w2"] + p["b2"]
    h = gn(h, p["g2"], p["be2"]) + x
    h = jax.nn.relu(h)
    return h @ p["wo"] + p["bo"]


def init_params(key, latent_size, num_preds):
    ks = jax.random.split(key, 6)
    L, P2 = latent_size, num_preds * 2
    scale = 1.0 / jnp.sqrt(L)
    return {
        "w1": jax.random.normal(ks[0], (L, L), jnp.float32) * scale,
        "b1": jax.random.normal(ks[1], (L,), jnp.float32) * 0.1,
        "g1": jnp.ones((L,), jnp.float32),
        "be1": jnp.zeros((L,), jnp.float32),
        "w2": jax.random.normal(ks[2], (L, L), jnp.float32) * scale,
        "b2": jax.random.normal(ks[3], (L,), jnp.float32) * 0.1,
        "g2": jnp.ones((L,), jnp.float32),
        "be2": jnp.zeros((L,), jnp.float32),
        "wo": jax.random.normal(ks[4], (L, P2), jnp.float32) * scale,
        "bo": jax.random.normal(ks[5], (P2,), jnp.float32) * 0.1,
    }


if __name__ == "__main__":
    key = jax.random.PRNGKey(0)
    k_x, k_p = jax.random.split(key)

    # latent_size=32, num_preds=4; ragged batch (20) exercises the row padding.
    N, L, NUM_PREDS = 20, 32, 4
    x = jax.random.normal(k_x, (N, L), jnp.float32)
    params = init_params(k_p, L, NUM_PREDS)
    ref = _reference(x, params)

    # f32 MXU path — strict check against the torch-semantics reference.
    out = jax.block_until_ready(prediction_net(x, params))
    assert out.shape == (N, NUM_PREDS * 2)
    assert jnp.allclose(out, ref, atol=1e-4, rtol=1e-4), "f32 mismatch vs reference"

    # bf16 MXU path (half the weight DMA bytes, 2x MXU rate on v6e/v7x);
    # GroupNorm / residual stay f32 in-kernel, so only matmul rounding differs.
    out_bf16 = jax.block_until_ready(
        prediction_net(x, params, mxu_dtype=jnp.bfloat16))
    assert jnp.allclose(out_bf16, ref, atol=5e-2, rtol=5e-2), "bf16 mismatch"

    print("KERNEL_OK")
</pallas_src>

<mosaic_0001>
module attributes {stable_mosaic.version = 11 : i64} {
  func.func @_prednet_kernel(%arg0: i32, %arg1: memref<24x128xf32, #tpu.memory_space<vmem>>, %arg2: memref<128x128xf32, #tpu.memory_space<vmem>>, %arg3: memref<128x128xf32, #tpu.memory_space<vmem>>, %arg4: memref<128x128xf32, #tpu.memory_space<vmem>>, %arg5: memref<8x128xf32, #tpu.memory_space<vmem>>, %arg6: memref<24x128xf32, #tpu.memory_space<vmem>>) attributes {dimension_semantics = [#tpu.dimension_semantics<parallel>], iteration_bounds = array<i64: 1>, scalar_prefetch = 0 : i64, scratch_operands = 0 : i64, tpu.core_type = #tpu.core_type<tc>, window_params = [{transform_indices = @transform_0, window_bounds = array<i64: 24, 128>}, {pipeline_mode = #tpu.pipeline_mode<synchronous>, transform_indices = @transform_1, window_bounds = array<i64: 128, 128>}, {pipeline_mode = #tpu.pipeline_mode<synchronous>, transform_indices = @transform_2, window_bounds = array<i64: 128, 128>}, {pipeline_mode = #tpu.pipeline_mode<synchronous>, transform_indices = @transform_3, window_bounds = array<i64: 128, 128>}, {pipeline_mode = #tpu.pipeline_mode<synchronous>, transform_indices = @transform_4, window_bounds = array<i64: 8, 128>}, {transform_indices = @transform_5, window_bounds = array<i64: 24, 128>}]} {
    %c0 = arith.constant 0 : index
    %c0_0 = arith.constant 0 : index
    %0 = vector.load %arg1[%c0, %c0_0] : memref<24x128xf32, #tpu.memory_space<vmem>>, vector<24x128xf32>
    %c0_1 = arith.constant 0 : index
    %c0_2 = arith.constant 0 : index
    %1 = vector.load %arg5[%c0_1, %c0_2] : memref<8x128xf32, #tpu.memory_space<vmem>>, vector<8x128xf32>
    %2 = vector.extract_strided_slice %1 {offsets = [0, 0], sizes = [1, 128], strides = [1, 1]} : vector<8x128xf32> to vector<1x128xf32>
    %3 = vector.extract_strided_slice %1 {offsets = [1, 0], sizes = [1, 128], strides = [1, 1]} : vector<8x128xf32> to vector<1x128xf32>
    %4 = vector.extract_strided_slice %1 {offsets = [2, 0], sizes = [1, 128], strides = [1, 1]} : vector<8x128xf32> to vector<1x128xf32>
    %5 = vector.extract_strided_slice %1 {offsets = [3, 0], sizes = [1, 128], strides = [1, 1]} : vector<8x128xf32> to vector<1x128xf32>
    %6 = vector.extract_strided_slice %1 {offsets = [4, 0], sizes = [1, 128], strides = [1, 1]} : vector<8x128xf32> to vector<1x128xf32>
    %7 = vector.extract_strided_slice %1 {offsets = [5, 0], sizes = [1, 128], strides = [1, 1]} : vector<8x128xf32> to vector<1x128xf32>
    %8 = vector.extract_strided_slice %1 {offsets = [6, 0], sizes = [1, 128], strides = [1, 1]} : vector<8x128xf32> to vector<1x128xf32>
    %c0_3 = arith.constant 0 : index
    %c0_4 = arith.constant 0 : index
    %9 = vector.load %arg2[%c0_3, %c0_4] : memref<128x128xf32, #tpu.memory_space<vmem>>, vector<128x128xf32>
    %cst = arith.constant dense<0.000000e+00> : vector<24x128xf32>
    %10 = tpu.matmul %0, %9, %cst {dimension_numbers = #tpu.dot_dimension_numbers<[1], [0], [0], [1], [0, 0, 1, 1], [], []>} : vector<24x128xf32>, vector<128x128xf32>, vector<24x128xf32> -> vector<24x128xf32>
    %11 = vector.broadcast %2 : vector<1x128xf32> to vector<24x128xf32>
    %12 = arith.addf %10, %11 : vector<24x128xf32>
    %cst_5 = arith.constant dense<0.000000e+00> : vector<24xf32>
    %13 = vector.multi_reduction <add>, %12, %cst_5 [1] : vector<24x128xf32> to vector<24xf32>
    %14 = vector.shape_cast %13 : vector<24xf32> to vector<24x1xf32>
    %15 = arith.mulf %12, %12 : vector<24x128xf32>
    %cst_6 = arith.constant dense<0.000000e+00> : vector<24xf32>
    %16 = vector.multi_reduction <add>, %15, %cst_6 [1] : vector<24x128xf32> to vector<24xf32>
    %17 = vector.shape_cast %16 : vector<24xf32> to vector<24x1xf32>
    %cst_7 = arith.constant 3.125000e-02 : f32
    %18 = vector.broadcast %cst_7 : f32 to vector<24x1xf32>
    %19 = arith.mulf %14, %18 : vector<24x1xf32>
    %cst_8 = arith.constant 3.125000e-02 : f32
    %20 = vector.broadcast %cst_8 : f32 to vector<24x1xf32>
    %21 = arith.mulf %17, %20 : vector<24x1xf32>
    %22 = arith.mulf %19, %19 : vector<24x1xf32>
    %23 = arith.subf %21, %22 : vector<24x1xf32>
    %cst_9 = arith.constant 0.000000e+00 : f32
    %24 = vector.broadcast %cst_9 : f32 to vector<24x1xf32>
    %25 = arith.maximumf %23, %24 : vector<24x1xf32>
    %cst_10 = arith.constant 9.99999974E-6 : f32
    %26 = vector.broadcast %cst_10 : f32 to vector<24x1xf32>
    %27 = arith.addf %25, %26 : vector<24x1xf32>
    %28 = math.rsqrt %27 : vector<24x1xf32>
    %29 = vector.broadcast %19 : vector<24x1xf32> to vector<24x128xf32>
    %30 = arith.subf %12, %29 : vector<24x128xf32>
    %31 = vector.broadcast %3 : vector<1x128xf32> to vector<24x128xf32>
    %32 = vector.broadcast %28 : vector<24x1xf32> to vector<24x128xf32>
    %33 = arith.mulf %31, %32 : vector<24x128xf32>
    %34 = arith.mulf %30, %33 : vector<24x128xf32>
    %35 = vector.broadcast %4 : vector<1x128xf32> to vector<24x128xf32>
    %36 = arith.addf %34, %35 : vector<24x128xf32>
    %cst_11 = arith.constant 0.000000e+00 : f32
    %37 = vector.broadcast %cst_11 : f32 to vector<24x128xf32>
    %38 = arith.maximumf %36, %37 : vector<24x128xf32>
    %c0_12 = arith.constant 0 : index
    %c0_13 = arith.constant 0 : index
    %39 = vector.load %arg3[%c0_12, %c0_13] : memref<128x128xf32, #tpu.memory_space<vmem>>, vector<128x128xf32>
    %cst_14 = arith.constant dense<0.000000e+00> : vector<24x128xf32>
    %40 = tpu.matmul %38, %39, %cst_14 {dimension_numbers = #tpu.dot_dimension_numbers<[1], [0], [0], [1], [0, 0, 1, 1], [], []>} : vector<24x128xf32>, vector<128x128xf32>, vector<24x128xf32> -> vector<24x128xf32>
    %41 = vector.broadcast %5 : vector<1x128xf32> to vector<24x128xf32>
    %42 = arith.addf %40, %41 : vector<24x128xf32>
    %cst_15 = arith.constant dense<0.000000e+00> : vector<24xf32>
    %43 = vector.multi_reduction <add>, %42, %cst_15 [1] : vector<24x128xf32> to vector<24xf32>
    %44 = vector.shape_cast %43 : vector<24xf32> to vector<24x1xf32>
    %45 = arith.mulf %42, %42 : vector<24x128xf32>
    %cst_16 = arith.constant dense<0.000000e+00> : vector<24xf32>
    %46 = vector.multi_reduction <add>, %45, %cst_16 [1] : vector<24x128xf32> to vector<24xf32>
    %47 = vector.shape_cast %46 : vector<24xf32> to vector<24x1xf32>
    %cst_17 = arith.constant 3.125000e-02 : f32
    %48 = vector.broadcast %cst_17 : f32 to vector<24x1xf32>
    %49 = arith.mulf %44, %48 : vector<24x1xf32>
    %cst_18 = arith.constant 3.125000e-02 : f32
    %50 = vector.broadcast %cst_18 : f32 to vector<24x1xf32>
    %51 = arith.mulf %47, %50 : vector<24x1xf32>
    %52 = arith.mulf %49, %49 : vector<24x1xf32>
    %53 = arith.subf %51, %52 : vector<24x1xf32>
    %cst_19 = arith.constant 0.000000e+00 : f32
    %54 = vector.broadcast %cst_19 : f32 to vector<24x1xf32>
    %55 = arith.maximumf %53, %54 : vector<24x1xf32>
    %cst_20 = arith.constant 9.99999974E-6 : f32
    %56 = vector.broadcast %cst_20 : f32 to vector<24x1xf32>
    %57 = arith.addf %55, %56 : vector<24x1xf32>
    %58 = math.rsqrt %57 : vector<24x1xf32>
    %59 = vector.broadcast %49 : vector<24x1xf32> to vector<24x128xf32>
    %60 = arith.subf %42, %59 : vector<24x128xf32>
    %61 = vector.broadcast %6 : vector<1x128xf32> to vector<24x128xf32>
    %62 = vector.broadcast %58 : vector<24x1xf32> to vector<24x128xf32>
    %63 = arith.mulf %61, %62 : vector<24x128xf32>
    %64 = arith.mulf %60, %63 : vector<24x128xf32>
    %65 = vector.broadcast %7 : vector<1x128xf32> to vector<24x128xf32>
    %66 = arith.addf %64, %65 : vector<24x128xf32>
    %67 = arith.addf %66, %0 : vector<24x128xf32>
    %cst_21 = arith.constant 0.000000e+00 : f32
    %68 = vector.broadcast %cst_21 : f32 to vector<24x128xf32>
    %69 = arith.maximumf %67, %68 : vector<24x128xf32>
    %c0_22 = arith.constant 0 : index
    %c0_23 = arith.constant 0 : index
    %70 = vector.load %arg4[%c0_22, %c0_23] : memref<128x128xf32, #tpu.memory_space<vmem>>, vector<128x128xf32>
    %cst_24 = arith.constant dense<0.000000e+00> : vector<24x128xf32>
    %71 = tpu.matmul %69, %70, %cst_24 {dimension_numbers = #tpu.dot_dimension_numbers<[1], [0], [0], [1], [0, 0, 1, 1], [], []>} : vector<24x128xf32>, vector<128x128xf32>, vector<24x128xf32> -> vector<24x128xf32>
    %72 = vector.broadcast %8 : vector<1x128xf32> to vector<24x128xf32>
    %73 = arith.addf %71, %72 : vector<24x128xf32>
    %c0_25 = arith.constant 0 : index
    %c0_26 = arith.constant 0 : index
    %74 = vector.load %arg6[%c0_25, %c0_26] : memref<24x128xf32, #tpu.memory_space<vmem>>, vector<24x128xf32>
    tpu.vector_store %arg6[%c0_25, %c0_26], %73 {strides = array<i32>} : memref<24x128xf32, #tpu.memory_space<vmem>>, vector<24x128xf32>,
    return
  }
  func.func @transform_0(%arg0: i32) -> (i32, i32) {
    %c0_i32 = arith.constant 0 : i32
    %c0_i32_0 = arith.constant 0 : i32
    return %arg0, %c0_i32 : i32, i32
  }
  func.func @transform_1(%arg0: i32) -> (i32, i32) {
    %c0_i32 = arith.constant 0 : i32
    %c0_i32_0 = arith.constant 0 : i32
    %c0_i32_1 = arith.constant 0 : i32
    return %c0_i32, %c0_i32_0 : i32, i32
  }
  func.func @transform_2(%arg0: i32) -> (i32, i32) {
    %c0_i32 = arith.constant 0 : i32
    %c0_i32_0 = arith.constant 0 : i32
    %c0_i32_1 = arith.constant 0 : i32
    return %c0_i32, %c0_i32_0 : i32, i32
  }
  func.func @transform_3(%arg0: i32) -> (i32, i32) {
    %c0_i32 = arith.constant 0 : i32
    %c0_i32_0 = arith.constant 0 : i32
    %c0_i32_1 = arith.constant 0 : i32
    return %c0_i32, %c0_i32_0 : i32, i32
  }
  func.func @transform_4(%arg0: i32) -> (i32, i32) {
    %c0_i32 = arith.constant 0 : i32
    %c0_i32_0 = arith.constant 0 : i32
    %c0_i32_1 = arith.constant 0 : i32
    return %c0_i32, %c0_i32_0 : i32, i32
  }
  func.func @transform_5(%arg0: i32) -> (i32, i32) {
    %c0_i32 = arith.constant 0 : i32
    %c0_i32_0 = arith.constant 0 : i32
    return %arg0, %c0_i32 : i32, i32
  }
}

</mosaic_0001>

<bundles_post_ra>
// kernel: tpu_custom_call.1
= control target key start
LH: loop header
LB: loop body
LE: loop exit
PB: predicated region body
PF: predicated region fallthrough
CT: control target
= control target key end

     0   :  { %10 = vsyncpa [#allocation3], 0  ;;  %s1179_s0 = inlined_call_operand.hbm [shape: f32[24,128], index: 0, kind: input, shape index: {}]   ;;  %s1180_s1 = inlined_call_operand.hbm [shape: f32[128,128], index: 1, kind: input, shape index: {}]   ;;  %s1181_s2 = inlined_call_operand.hbm [shape: f32[128,128], index: 2, kind: input, shape index: {}]   ;;  %s1182_s3 = inlined_call_operand.hbm [shape: f32[128,128], index: 3, kind: input, shape index: {}]   ;;  %s1183_s4 = inlined_call_operand.vmem [shape: f32[8,128], index: 4, kind: input, shape index: {}]   ;;  %s1184_s5 = inlined_call_operand.hbm [shape: f32[24,128], index: 5, kind: output, shape index: {}]  }
   0x1   :  { %11 = vsyncpa [#allocation6], 0 }
   0x2   :  { %12 = vsyncpa [#allocation9], 0 }
   0x3   :  { %13 = vsyncpa [#allocation4], 0  ;;  %s931_s18 = smov [#allocation5]   ;;  %s932_s20 = smov [#allocation2]  }
   0x4   :  { %s31_s19 = sshll.u32 %s931_s18, 4  ;;  %s19_s21 = sshll.u32 %s932_s20, 4  ;;  %s32_s19 = int_to_ptr.vmem [resolvable:$true] %s31_s19  ;;  %s971_s21 = int_to_ptr.vmem [resolvable:$true] %s19_s21 }
   0x5   :  { %s813_s24 = scalar_lea.hbm %s1180_s1, 2048 }
   0x6   :  { %p814_p0 = scmp.ne.s32.totalorder %s1180_s1, %s813_s24  ;;  %p817_p1 = scmp.lt.u32.totalorder %s813_s24, %s1180_s1 }
   0x8   :  { %p819_p2 = pnand %p817_p1, %p814_p0 }
   0xa   :  { %822 = shalt.err (!%p819_p2)
}
   0xb   :  { %s823_s29 = scalar_lea.vmem %s32_s19, 2048  ;;  %p828_p4 = scmp.lt.s32.totalorder %s32_s19, %s32_s19 }
   0xc   :  { %p824_p3 = scmp.ne.s32.totalorder %s32_s19, %s823_s29  ;;  %p829_p5 = scmp.lt.s32.totalorder %s823_s29, %s823_s29 }
   0xe   :  { %p830_p6 = por %p829_p5, %p828_p4 }
  0x10   :  { %p831_p7 = pnand %p830_p6, %p824_p3 }
  0x12   :  { %834 = shalt.err (!%p831_p7)
}
  0x13   :  { %s933_s30 = smov 128   ;;  %s934_s6 = smov 8  }
  0x14   :  { %37 = dma.hbm_to_vmem [thread:$0]  %s1180_s1, 2048, %s32_s19, [#allocation6], %s933_s30, %s933_s30, %s934_s6  }
  0x15   :  { %s835_s11 = scalar_lea.hbm %s1179_s0, 384 }
  0x16   :  { %p836_p8 = scmp.ne.s32.totalorder %s1179_s0, %s835_s11  ;;  %p839_p9 = scmp.lt.u32.totalorder %s835_s11, %s1179_s0 }
  0x18   :  { %p841_p10 = pnand %p839_p9, %p836_p8 }
  0x1a   :  { %844 = shalt.err (!%p841_p10)
}
  0x1b   :  { %s845_s16 = scalar_lea.vmem %s971_s21, 384  ;;  %p850_p12 = scmp.lt.s32.totalorder %s971_s21, %s971_s21 }
  0x1c   :  { %p846_p11 = scmp.ne.s32.totalorder %s971_s21, %s845_s16  ;;  %p851_p13 = scmp.lt.s32.totalorder %s845_s16, %s845_s16 }
  0x1e   :  { %p852_p0 = por %p851_p13, %p850_p12 }
  0x20   :  { %p853_p1 = pnand %p852_p0, %p846_p11 }
  0x22   :  { %856 = shalt.err (!%p853_p1)
}
  0x23   :  { %25 = dma.hbm_to_vmem [thread:$0]  %s1179_s0, 384, %s971_s21, [#allocation3], %s933_s30, %s933_s30, %s934_s6  }
  0x24   :  { %s935_s18 = smov [#allocation7]   ;;  %s936_s20 = smov [#allocation8]  }
  0x25   :  { %s43_s19 = sshll.u32 %s935_s18, 4  ;;  %s55_s22 = sshll.u32 %s936_s20, 4  ;;  %s44_s19 = int_to_ptr.vmem [resolvable:$true] %s43_s19  ;;  %s1008_s22 = int_to_ptr.vmem [resolvable:$true] %s55_s22 }
  0x26   :  { %s857_s25 = scalar_lea.hbm %s1181_s2, 2048 }
  0x27   :  { %p858_p2 = scmp.ne.s32.totalorder %s1181_s2, %s857_s25  ;;  %p861_p3 = scmp.lt.u32.totalorder %s857_s25, %s1181_s2 }
  0x29   :  { %p863_p4 = pnand %p861_p3, %p858_p2 }
  0x2b   :  { %866 = shalt.err (!%p863_p4)
}
  0x2c   :  { %s867_s0 = scalar_lea.vmem %s44_s19, 2048  ;;  %p872_p6 = scmp.lt.s32.totalorder %s44_s19, %s44_s19 }
  0x2d   :  { %p868_p5 = scmp.ne.s32.totalorder %s44_s19, %s867_s0  ;;  %p873_p7 = scmp.lt.s32.totalorder %s867_s0, %s867_s0 }
  0x2f   :  { %p874_p8 = por %p873_p7, %p872_p6 }
  0x31   :  { %p875_p9 = pnand %p874_p8, %p868_p5 }
  0x33   :  { %878 = shalt.err (!%p875_p9)
}
  0x34   :  { %49 = dma.hbm_to_vmem [thread:$0]  %s1181_s2, 2048, %s44_s19, [#allocation6], %s933_s30, %s933_s30, %s934_s6  }
  0x35   :  { %s879_s10 = scalar_lea.hbm %s1182_s3, 2048 }
  0x36   :  { %p880_p10 = scmp.ne.s32.totalorder %s1182_s3, %s879_s10  ;;  %p883_p11 = scmp.lt.u32.totalorder %s879_s10, %s1182_s3 }
  0x38   :  { %p885_p12 = pnand %p883_p11, %p880_p10 }
  0x3a   :  { %888 = shalt.err (!%p885_p12)
}
  0x3b   :  { %s889_s15 = scalar_lea.vmem %s1008_s22, 2048  ;;  %p894_p0 = scmp.lt.s32.totalorder %s1008_s22, %s1008_s22 }
  0x3c   :  { %p890_p13 = scmp.ne.s32.totalorder %s1008_s22, %s889_s15  ;;  %p895_p1 = scmp.lt.s32.totalorder %s889_s15, %s889_s15 }
  0x3e   :  { %p896_p2 = por %p895_p1, %p894_p0 }
  0x40   :  { %p897_p3 = pnand %p896_p2, %p890_p13 }
  0x42   :  { %900 = shalt.err (!%p897_p3)
}
  0x43   :  { %61 = dma.hbm_to_vmem [thread:$0]  %s1182_s3, 2048, %s1008_s22, [#allocation9], %s933_s30, %s933_s30, %s934_s6  }
  0x44   :  { %923 = dma.done.wait [#allocation3], 384  }
  0x45   :  { %924 = vsyncadd [#allocation3], 4294966912 }
  0x46   :  { %925 = dma.done.wait [#allocation6], 4096  }
  0x47   :  { %926 = vsyncadd [#allocation6], 4294963200 }
  0x48   :  { %927 = dma.done.wait [#allocation9], 2048  }
  0x49   :  { %928 = vsyncadd [#allocation9], 4294965248  ;;  %v937_v0 = vmov 0.0|0.0   ;;  %vm938_vm0 = vmmov 0   ;;  %v939_v1 = vmov 0.0   ;;  %v80_v2 = vld [vmem:[#allocation5] sm:$0xff]  ;;  %v96_v29 = vlaneseq }
  0x4a   :  { %703 = vmatprep.subr.bf16.mxu0 %v937_v0  ;;  %612 = vmatprep.mubr.msk.f32.mxu0 %vm938_vm0, %v939_v1  ;;  %v81_v3 = vld [vmem:[#allocation5 + $0x8] sm:$0xff]  ;;  %v82_v4 = vld [vmem:[#allocation5 + $0x10] sm:$0xff]  ;;  %v83_v6 = vld [vmem:[#allocation5 + $0x18] sm:$0xff] }
  0x4b   :  { %727 = vmatprep.subr.bf16.mxu1 %v937_v0  ;;  %653 = vmatprep.mubr.msk.f32.mxu1 %vm938_vm0, %v939_v1  ;;  %v704_v5 = vpack.c.bf16 %v81_v3, %v80_v2  ;;  %v707_v7 = vpack.c.bf16 %v83_v6, %v82_v4  ;;  %v84_v8 = vld [vmem:[#allocation5 + $0x20] sm:$0xff]  ;;  %v85_v9 = vld [vmem:[#allocation5 + $0x28] sm:$0xff]  ;;  %v86_v11 = vld [vmem:[#allocation5 + $0x30] sm:$0xff]  ;;  %v1074_v30 = vshrl.u32 %v96_v29, 7 }
  0x4c   :  { %v710_v10 = vpack.c.bf16 %v85_v9, %v84_v8  ;;  %v87_v12 = vld [vmem:[#allocation5 + $0x38] sm:$0xff]  ;;  %v88_v14 = vld [vmem:[#allocation5 + $0x40] sm:$0xff]  ;;  %v89_v15 = vld [vmem:[#allocation5 + $0x48] sm:$0xff] }
  0x4d   :  { %705 = vmatpush3.bf16.msra.mxu0 %v704_v5  ;;  %v713_v13 = vpack.c.bf16 %v87_v12, %v86_v11  ;;  %v716_v16 = vpack.c.bf16 %v89_v15, %v88_v14  ;;  %v90_v17 = vld [vmem:[#allocation5 + $0x50] sm:$0xff]  ;;  %v91_v18 = vld [vmem:[#allocation5 + $0x58] sm:$0xff]  ;;  %v92_v20 = vld [vmem:[#allocation5 + $0x60] sm:$0xff]  ;;  %v98_v31 = vsub.s32 0, %v1074_v30 }
  0x4e   :  { %706 = vmatprep.subr.bf16.mxu0 %v937_v0  ;;  %v719_v19 = vpack.c.bf16 %v91_v18, %v90_v17  ;;  %v93_v21 = vld [vmem:[#allocation5 + $0x68] sm:$0xff]  ;;  %v94_v23 = vld [vmem:[#allocation5 + $0x70] sm:$0xff]  ;;  %v95_v24 = vld [vmem:[#allocation5 + $0x78] sm:$0xff] }
  0x4f   :  { %v722_v22 = vpack.c.bf16 %v93_v21, %v92_v20  ;;  %v725_v25 = vpack.c.bf16 %v95_v24, %v94_v23  ;;  %v1058_v26 = vld [vmem:[#allocation2] sm:$0xff]  ;;  %v1064_v27 = vld [vmem:[#allocation2 + $0x8] sm:$0xff]  ;;  %v1069_v28 = vld [vmem:[#allocation2 + $0x10] sm:$0xff] }
  0x50   :  { %v1080_v32 = vld [vmem:[%s1183_s4] sm:$0xff]  ;;  %v239_v46 = vld [vmem:[#allocation7] sm:$0xff]  ;;  %v241_v49 = vld [vmem:[#allocation7 + $0x10] sm:$0xff]  ;;  %s940_s4 = smov [#allocation10]  }
  0x51   :  { %708 = vmatpush3.bf16.msra.mxu0 %v707_v7  ;;  %v99_v33 = vrot.slane %v1080_v32, %v98_v31  ;;  %v240_v47 = vld [vmem:[#allocation7 + $0x8] sm:$0xff]  ;;  %v242_v50 = vld [vmem:[#allocation7 + $0x18] sm:$0xff]  ;;  %v243_v52 = vld [vmem:[#allocation7 + $0x20] sm:$0xff]  ;;  %s509_s17 = sshll.u32 %s940_s4, 4  ;;  %s510_s17 = int_to_ptr.vmem [resolvable:$true] %s509_s17 }
  0x52   :  { %709 = vmatprep.subr.bf16.mxu0 %v937_v0  ;;  %v728_v48 = vpack.c.bf16 %v240_v47, %v239_v46  ;;  %v731_v51 = vpack.c.bf16 %v242_v50, %v241_v49  ;;  %v244_v53 = vld [vmem:[#allocation7 + $0x28] sm:$0xff]  ;;  %v245_v55 = vld [vmem:[#allocation7 + $0x30] sm:$0xff]  ;;  %v246_v56 = vld [vmem:[#allocation7 + $0x38] sm:$0xff]  ;;  %s901_s18 = scalar_lea.vmem %s510_s17, 384  ;;  %p906_p5 = scmp.lt.s32.totalorder %s510_s17, %s510_s17 }
  0x53   :  { %v734_v54 = vpack.c.bf16 %v244_v53, %v243_v52  ;;  %v737_v57 = vpack.c.bf16 %v246_v56, %v245_v55  ;;  %v247_v58 = vld [vmem:[#allocation7 + $0x40] sm:$0xff]  ;;  %v248_v59 = vld [vmem:[#allocation7 + $0x48] sm:$0xff]  ;;  %v249_v61 = vld [vmem:[#allocation7 + $0x50] sm:$0xff]  ;;  %p902_p4 = scmp.ne.s32.totalorder %s510_s17, %s901_s18  ;;  %p907_p6 = scmp.lt.s32.totalorder %s901_s18, %s901_s18 }
  0x54   :  { %729 = vmatpush3.bf16.msra.mxu1 %v728_v48  ;;  %v740_v60 = vpack.c.bf16 %v248_v59, %v247_v58  ;;  %v250_v62 = vld [vmem:[#allocation7 + $0x58] sm:$0xff]  ;;  %v251_v2 = vld [vmem:[#allocation7 + $0x60] sm:$0xff]  ;;  %v252_v3 = vld [vmem:[#allocation7 + $0x68] sm:$0xff] }
  0x55   :  { %711 = vmatpush3.bf16.msra.mxu0 %v710_v10  ;;  %730 = vmatprep.subr.bf16.mxu1 %v937_v0  ;;  %v743_v63 = vpack.c.bf16 %v250_v62, %v249_v61  ;;  %v746_v4 = vpack.c.bf16 %v252_v3, %v251_v2  ;;  %v253_v5 = vld [vmem:[#allocation7 + $0x70] sm:$0xff]  ;;  %v254_v6 = vld [vmem:[#allocation7 + $0x78] sm:$0xff]  ;;  %p908_p7 = por %p907_p6, %p906_p5 }
  0x56   :  { %712 = vmatprep.subr.bf16.mxu0 %v937_v0  ;;  %v749_v7 = vpack.c.bf16 %v254_v6, %v253_v5 }
  0x57   :  { %p909_p8 = pnand %p908_p7, %p902_p4 }
  0x58   :  { %732 = vmatpush3.bf16.msra.mxu1 %v731_v51 }
  0x59   :  { %714 = vmatpush3.bf16.msra.mxu0 %v713_v13  ;;  %733 = vmatprep.subr.bf16.mxu1 %v937_v0 }
  0x5a   :  { %715 = vmatprep.subr.bf16.mxu0 %v937_v0 }
  0x5c   :  { %735 = vmatpush3.bf16.msra.mxu1 %v734_v54 }
  0x5d   :  { %717 = vmatpush3.bf16.msra.mxu0 %v716_v16  ;;  %736 = vmatprep.subr.bf16.mxu1 %v937_v0 }
  0x5e   :  { %718 = vmatprep.subr.bf16.mxu0 %v937_v0 }
  0x60   :  { %738 = vmatpush3.bf16.msra.mxu1 %v737_v57 }
  0x61   :  { %720 = vmatpush3.bf16.msra.mxu0 %v719_v19  ;;  %739 = vmatprep.subr.bf16.mxu1 %v937_v0 }
  0x62   :  { %721 = vmatprep.subr.bf16.mxu0 %v937_v0 }
  0x64   :  { %741 = vmatpush3.bf16.msra.mxu1 %v740_v60 }
  0x65   :  { %723 = vmatpush3.bf16.msra.mxu0 %v722_v22  ;;  %742 = vmatprep.subr.bf16.mxu1 %v937_v0 }
  0x66   :  { %724 = vmatprep.subr.bf16.mxu0 %v937_v0 }
  0x68   :  { %744 = vmatpush3.bf16.msra.mxu1 %v743_v63 }
  0x69   :  { %726 = vmatpush3.bf16.msra.mxu0 %v725_v25  ;;  %745 = vmatprep.subr.bf16.mxu1 %v937_v0 }
  0x6a   :  { %751 = vmatprep.subr.bf16.mxu0 %v937_v0 }
  0x6c   :  { %613 = vmatmul.mubr.f32.vlgmr.msra.gmra.mrb[0].mxu0 %v1058_v26  ;;  %747 = vmatpush3.bf16.msra.mxu1 %v746_v4 }
  0x6d   :  { %615 = vmatprep.mubr.msk.f32.mxu0 %vm938_vm0, %v939_v1  ;;  %748 = vmatprep.subr.bf16.mxu1 %v937_v0 }
  0x70   :  { %616 = vmatmul.mubr.f32.gmra.mrb[2].mxu0 %v1064_v27  ;;  %750 = vmatpush3.bf16.msra.mxu1 %v749_v7 }
  0x71   :  { %618 = vmatprep.mubr.msk.f32.mxu0 %vm938_vm0, %v939_v1  ;;  %775 = vmatprep.subr.bf16.mxu1 %v937_v0 }
  0x74   :  { %619 = vmatmul.mubr.f32.gmra.mrb[4].mxu0 %v1069_v28 }
  0x75   :  { %694 = vmatprep.mubr.msk.f32.mxu0 %vm938_vm0, %v939_v1 }
 0x13f   :  { %v166_v34 = vpop.f32.mrb[0].mxu0 }
 0x140   :  { %v1083_v35 = vadd.f32 %v166_v34, %v99_v33  ;;  %v614_v36 = vpop.f32.mrb[1].mxu0 }
 0x141   :  { %v221_v36 = vsub.s32 1, %v1074_v30 }
 0x142   :  { %180 = vadd.xlane.f32.xlu0 %v1083_v35  ;;  %v186_v40 = vmul.f32 %v1083_v35, %v1083_v35 }
 0x143   :  { %v171_v37 = vpop.f32.mrb[2].mxu0 }
 0x144   :  { %v1086_v38 = vadd.f32 %v171_v37, %v99_v33  ;;  %v617_v39 = vpop.f32.mrb[3].mxu0 }
 0x146   :  { %189 = vadd.xlane.f32.xlu0 %v186_v40  ;;  %182 = vadd.xlane.f32.xlu1 %v1086_v38  ;;  %v187_v43 = vmul.f32 %v1086_v38, %v1086_v38  ;;  %v222_v40 = vrot.slane %v1080_v32, %v221_v36  ;;  %v414_v36 = vld [vmem:[#allocation8 + $0x68] sm:$0xff] }
 0x147   :  { %v176_v41 = vpop.f32.mrb[4].mxu0 }
 0x148   :  { %v1091_v42 = vadd.f32 %v176_v41, %v99_v33  ;;  %v620_v44 = vpop.f32.mrb[5].mxu0  ;;  %v231_v41 = vsub.s32 2, %v1074_v30 }
 0x14a   :  { %191 = vadd.xlane.f32.xlu1 %v187_v43  ;;  %184 = vadd.xlane.f32.xlu0 %v1091_v42  ;;  %v188_v45 = vmul.f32 %v1091_v42, %v1091_v42  ;;  %v232_v46 = vrot.slane %v1080_v32, %v231_v41 }
 0x14e   :  { %193 = vadd.xlane.f32.xlu1 %v188_v45 }
 0x1cf   :  { %v181_v8 = vpop.xlane.xlu0 %180 }
 0x1d0   :  { %v195_v9 = vmul.f32 0.03125, %v181_v8 }
 0x1d2   :  { %v201_v12 = vmul.f32 %v195_v9, %v195_v9  ;;  %v216_v44 = vsub.f32 %v1083_v35, %v195_v9 }
 0x1d3   :  { %v190_v10 = vpop.xlane.xlu0 %189  ;;  %v183_v11 = vpop.xlane.xlu1 %182 }
 0x1d4   :  { %v198_v13 = vmul.f32 0.03125, %v190_v10  ;;  %v196_v14 = vmul.f32 0.03125, %v183_v11  ;;  %v401_v11 = vld [vmem:[#allocation8] sm:$0xff] }
 0x1d6   :  { %v204_v15 = vsub.f32 %v198_v13, %v201_v12  ;;  %v202_v19 = vmul.f32 %v196_v14, %v196_v14  ;;  %v217_v49 = vsub.f32 %v1086_v38, %v196_v14  ;;  %v402_v12 = vld [vmem:[#allocation8 + $0x8] sm:$0xff]  ;;  %v403_v14 = vld [vmem:[#allocation8 + $0x10] sm:$0xff] }
 0x1d7   :  { %v192_v16 = vpop.xlane.xlu1 %191  ;;  %v185_v17 = vpop.xlane.xlu0 %184  ;;  %v752_v13 = vpack.c.bf16 %v402_v12, %v401_v11 }
 0x1d8   :  { %v207_v18 = vmax.f32 %v204_v15, 0.0  ;;  %v199_v20 = vmul.f32 0.03125, %v192_v16  ;;  %v197_v21 = vmul.f32 0.03125, %v185_v17  ;;  %v404_v15 = vld [vmem:[#allocation8 + $0x18] sm:$0xff]  ;;  %v405_v17 = vld [vmem:[#allocation8 + $0x20] sm:$0xff] }
 0x1d9   :  { %753 = vmatpush3.bf16.msra.mxu0 %v752_v13  ;;  %v755_v16 = vpack.c.bf16 %v404_v15, %v403_v14 }
 0x1da   :  { %v210_v22 = vadd.f32 1e-05, %v207_v18  ;;  %v205_v23 = vsub.f32 %v199_v20, %v202_v19  ;;  %v203_v24 = vmul.f32 %v197_v21, %v197_v21  ;;  %v218_v55 = vsub.f32 %v1091_v42, %v197_v21  ;;  %754 = vmatprep.subr.bf16.mxu0 %v937_v0  ;;  %v406_v18 = vld [vmem:[#allocation8 + $0x28] sm:$0xff]  ;;  %v407_v20 = vld [vmem:[#allocation8 + $0x30] sm:$0xff]  ;;  %v408_v21 = vld [vmem:[#allocation8 + $0x38] sm:$0xff] }
 0x1db   :  { %v194_v25 = vpop.xlane.xlu1 %193  ;;  %v257_v42 = vsub.s32 3, %v1074_v30  ;;  %v758_v19 = vpack.c.bf16 %v406_v18, %v405_v17 }
 0x1dc   :  { %801 = vrsqrt.f32 %v210_v22  ;;  %v208_v29 = vmax.f32 %v205_v23, 0.0  ;;  %v200_v31 = vmul.f32 0.03125, %v194_v25  ;;  %v761_v22 = vpack.c.bf16 %v408_v21, %v407_v20  ;;  %v409_v23 = vld [vmem:[#allocation8 + $0x40] sm:$0xff] }
 0x1dd   :  { %v258_v62 = vrot.slane %v1080_v32, %v257_v42  ;;  %756 = vmatpush3.bf16.msra.mxu0 %v755_v16 }
 0x1de   :  { %v211_v33 = vadd.f32 1e-05, %v208_v29  ;;  %v206_v34 = vsub.f32 %v200_v31, %v203_v24  ;;  %757 = vmatprep.subr.bf16.mxu0 %v937_v0  ;;  %v410_v24 = vld [vmem:[#allocation8 + $0x48] sm:$0xff]  ;;  %v411_v29 = vld [vmem:[#allocation8 + $0x50] sm:$0xff]  ;;  %v412_v31 = vld [vmem:[#allocation8 + $0x58] sm:$0xff] }
 0x1df   :  { %v764_v25 = vpack.c.bf16 %v410_v24, %v409_v23 }
 0x1e0   :  { %803 = vrsqrt.f32 %v211_v33  ;;  %v209_v37 = vmax.f32 %v206_v34, 0.0  ;;  %v767_v33 = vpack.c.bf16 %v412_v31, %v411_v29  ;;  %v413_v34 = vld [vmem:[#allocation8 + $0x60] sm:$0xff] }
 0x1e1   :  { %759 = vmatpush3.bf16.msra.mxu0 %v758_v19 }
 0x1e2   :  { %v212_v39 = vadd.f32 1e-05, %v209_v37  ;;  %760 = vmatprep.subr.bf16.mxu0 %v937_v0  ;;  %v770_v37 = vpack.c.bf16 %v414_v36, %v413_v34 }
 0x1e4   :  { %805 = vrsqrt.f32 %v212_v39  ;;  %v415_v39 = vld [vmem:[#allocation8 + $0x70] sm:$0xff] }
 0x1e5   :  { %762 = vmatpush3.bf16.msra.mxu0 %v761_v22 }
 0x1e6   :  { %v802_v43 = vpop.eup %801  ;;  %763 = vmatprep.subr.bf16.mxu0 %v937_v0 }
 0x1e7   :  { %v223_v45 = vmul.f32 %v802_v43, %v222_v40 }
 0x1e9   :  { %v226_v47 = vmul.f32 %v223_v45, %v216_v44  ;;  %765 = vmatpush3.bf16.msra.mxu0 %v764_v25 }
 0x1ea   :  { %v804_v48 = vpop.eup %803  ;;  %766 = vmatprep.subr.bf16.mxu0 %v937_v0 }
 0x1eb   :  { %v233_v50 = vadd.f32 %v232_v46, %v226_v47  ;;  %v224_v51 = vmul.f32 %v804_v48, %v222_v40 }
 0x1ed   :  { %v236_v52 = vmax.f32 %v233_v50, 0.0  ;;  %v227_v53 = vmul.f32 %v224_v51, %v217_v49  ;;  %768 = vmatpush3.bf16.msra.mxu0 %v767_v33 }
 0x1ee   :  { %v806_v54 = vpop.eup %805  ;;  %769 = vmatprep.subr.bf16.mxu0 %v937_v0 }
 0x1ef   :  { %654 = vmatmul.mubr.f32.vlgmr.msra.gmra.mrb[0].mxu1 %v236_v52  ;;  %v234_v56 = vadd.f32 %v232_v46, %v227_v53  ;;  %v225_v57 = vmul.f32 %v806_v54, %v222_v40  ;;  %v416_v40 = vld [vmem:[#allocation8 + $0x78] sm:$0xff] }
 0x1f0   :  { %656 = vmatprep.mubr.msk.f32.mxu1 %vm938_vm0, %v939_v1  ;;  %783 = vmatpush3.bf16.msra.mxu1 %v752_v13  ;;  %v773_v41 = vpack.c.bf16 %v416_v40, %v415_v39 }
 0x1f1   :  { %v237_v35 = vmax.f32 %v234_v56, 0.0  ;;  %v228_v58 = vmul.f32 %v225_v57, %v218_v55  ;;  %776 = vmatprep.subr.bf16.mxu1 %v937_v0  ;;  %771 = vmatpush3.bf16.msra.mxu0 %v770_v37 }
 0x1f2   :  { %772 = vmatprep.subr.bf16.mxu0 %v937_v0 }
 0x1f3   :  { %657 = vmatmul.mubr.f32.gmra.mrb[2].mxu1 %v237_v35  ;;  %v235_v59 = vadd.f32 %v232_v46, %v228_v58 }
 0x1f4   :  { %659 = vmatprep.mubr.msk.f32.mxu1 %vm938_vm0, %v939_v1  ;;  %784 = vmatpush3.bf16.msra.mxu1 %v755_v16 }
 0x1f5   :  { %v238_v38 = vmax.f32 %v235_v59, 0.0  ;;  %777 = vmatprep.subr.bf16.mxu1 %v937_v0  ;;  %774 = vmatpush3.bf16.msra.mxu0 %v773_v41 }
 0x1f7   :  { %660 = vmatmul.mubr.f32.gmra.mrb[4].mxu1 %v238_v38 }
 0x1f8   :  { %697 = vmatprep.mubr.msk.f32.mxu1 %vm938_vm0, %v939_v1  ;;  %785 = vmatpush3.bf16.msra.mxu1 %v758_v19 }
 0x1f9   :  { %778 = vmatprep.subr.bf16.mxu1 %v937_v0 }
 0x1fc   :  { %786 = vmatpush3.bf16.msra.mxu1 %v761_v22 }
 0x1fd   :  { %779 = vmatprep.subr.bf16.mxu1 %v937_v0 }
 0x200   :  { %787 = vmatpush3.bf16.msra.mxu1 %v764_v25 }
 0x201   :  { %780 = vmatprep.subr.bf16.mxu1 %v937_v0 }
 0x204   :  { %788 = vmatpush3.bf16.msra.mxu1 %v767_v33 }
 0x205   :  { %781 = vmatprep.subr.bf16.mxu1 %v937_v0 }
 0x208   :  { %789 = vmatpush3.bf16.msra.mxu1 %v770_v37 }
 0x209   :  { %782 = vmatprep.subr.bf16.mxu1 %v937_v0 }
 0x20c   :  { %790 = vmatpush3.bf16.msra.mxu1 %v773_v41 }
 0x2c2   :  { %v325_v60 = vpop.f32.mrb[0].mxu1 }
 0x2c3   :  { %v655_v61 = vpop.f32.mrb[1].mxu1  ;;  %v1126_v6 = vadd.f32 %v325_v60, %v258_v62  ;;  %v380_v60 = vsub.s32 4, %v1074_v30 }
 0x2c5   :  { %v345_v9 = vmul.f32 %v1126_v6, %v1126_v6 }
 0x2c6   :  { %v330_v63 = vpop.f32.mrb[2].mxu1 }
 0x2c7   :  { %v1121_v2 = vadd.f32 %v330_v63, %v258_v62  ;;  %v658_v3 = vpop.f32.mrb[3].mxu1 }
 0x2c8   :  { %v381_v3 = vrot.slane %v1080_v32, %v380_v60 }
 0x2c9   :  { %341 = vadd.xlane.f32.xlu0 %v1121_v2  ;;  %v346_v4 = vmul.f32 %v1121_v2, %v1121_v2 }
 0x2ca   :  { %v335_v5 = vpop.f32.mrb[4].mxu1 }
 0x2cb   :  { %350 = vadd.xlane.f32.xlu1 %v346_v4  ;;  %v661_v7 = vpop.f32.mrb[5].mxu1  ;;  %v1128_v8 = vadd.f32 %v335_v5, %v258_v62  ;;  %v390_v4 = vsub.s32 5, %v1074_v30 }
 0x2cd   :  { %339 = vadd.xlane.f32.xlu0 %v1126_v6  ;;  %v347_v10 = vmul.f32 %v1128_v8, %v1128_v8 }
 0x2cf   :  { %343 = vadd.xlane.f32.xlu1 %v1128_v8 }
 0x2d1   :  { %348 = vadd.xlane.f32.xlu0 %v345_v9 }
 0x2d3   :  { %352 = vadd.xlane.f32.xlu1 %v347_v10  ;;  %v391_v10 = vrot.slane %v1080_v32, %v390_v4 }
 0x356   :  { %v342_v43 = vpop.xlane.xlu0 %341 }
 0x357   :  { %v355_v44 = vmul.f32 0.03125, %v342_v43 }
 0x358   :  { %v351_v45 = vpop.xlane.xlu1 %350 }
 0x359   :  { %v361_v46 = vmul.f32 %v355_v44, %v355_v44  ;;  %v358_v47 = vmul.f32 0.03125, %v351_v45  ;;  %v376_v7 = vsub.f32 %v1121_v2, %v355_v44 }
 0x35a   :  { %v340_v48 = vpop.xlane.xlu0 %339 }
 0x35b   :  { %v364_v49 = vsub.f32 %v358_v47, %v361_v46  ;;  %v354_v50 = vmul.f32 0.03125, %v340_v48 }
 0x35c   :  { %v344_v51 = vpop.xlane.xlu1 %343 }
 0x35d   :  { %v367_v52 = vmax.f32 %v364_v49, 0.0  ;;  %v356_v53 = vmul.f32 0.03125, %v344_v51  ;;  %v360_v56 = vmul.f32 %v354_v50, %v354_v50  ;;  %v375_v14 = vsub.f32 %v1126_v6, %v354_v50 }
 0x35e   :  { %v349_v54 = vpop.xlane.xlu0 %348 }
 0x35f   :  { %v370_v55 = vadd.f32 1e-05, %v367_v52  ;;  %v357_v57 = vmul.f32 0.03125, %v349_v54  ;;  %v362_v0 = vmul.f32 %v356_v53, %v356_v53  ;;  %v377_v18 = vsub.f32 %v1128_v8, %v356_v53 }
 0x360   :  { %v353_v35 = vpop.xlane.xlu1 %352  ;;  %v419_v8 = vsub.s32 6, %v1074_v30 }
 0x361   :  { %807 = vrsqrt.f32 %v370_v55  ;;  %v363_v58 = vsub.f32 %v357_v57, %v360_v56  ;;  %v359_v59 = vmul.f32 0.03125, %v353_v35 }
 0x362   :  { %v420_v29 = vrot.slane %v1080_v32, %v419_v8 }
 0x363   :  { %v366_v38 = vmax.f32 %v363_v58, 0.0  ;;  %v365_v42 = vsub.f32 %v359_v59, %v362_v0 }
 0x365   :  { %v369_v61 = vadd.f32 1e-05, %v366_v38  ;;  %v368_v62 = vmax.f32 %v365_v42, 0.0 }
 0x367   :  { %809 = vrsqrt.f32 %v369_v61  ;;  %v371_v63 = vadd.f32 1e-05, %v368_v62 }
 0x369   :  { %811 = vrsqrt.f32 %v371_v63 }
 0x36b   :  { %v808_v5 = vpop.eup %807 }
 0x36c   :  { %v383_v9 = vmul.f32 %v808_v5, %v381_v3 }
 0x36e   :  { %v386_v11 = vmul.f32 %v383_v9, %v376_v7 }
 0x370   :  { %v393_v12 = vadd.f32 %v391_v10, %v386_v11 }
 0x371   :  { %v810_v13 = vpop.eup %809 }
 0x372   :  { %v382_v15 = vmul.f32 %v810_v13, %v381_v3  ;;  %v396_v16 = vadd.f32 %v393_v12, %v1064_v27 }
 0x373   :  { %v812_v17 = vpop.eup %811 }
 0x374   :  { %v385_v19 = vmul.f32 %v382_v15, %v375_v14  ;;  %v399_v20 = vmax.f32 %v396_v16, 0.0  ;;  %v384_v21 = vmul.f32 %v812_v17, %v381_v3 }
 0x376   :  { %698 = vmatmul.mubr.f32.vlgmr.msra.gmra.mrb[6].mxu1 %v399_v20  ;;  %v392_v22 = vadd.f32 %v391_v10, %v385_v19  ;;  %v387_v2 = vmul.f32 %v384_v21, %v377_v18 }
 0x377   :  { %700 = vmatprep.mubr.msk.f32.mxu1 %vm938_vm0, %v939_v1 }
 0x378   :  { %v395_v23 = vadd.f32 %v392_v22, %v1058_v26  ;;  %v394_v24 = vadd.f32 %v391_v10, %v387_v2 }
 0x37a   :  { %v398_v25 = vmax.f32 %v395_v23, 0.0  ;;  %v397_v6 = vadd.f32 %v394_v24, %v1069_v28 }
 0x37c   :  { %695 = vmatmul.mubr.f32.vlgmr.msra.gmra.mrb[6].mxu0 %v398_v25  ;;  %v400_v27 = vmax.f32 %v397_v6, 0.0 }
 0x37e   :  { %701 = vmatmul.mubr.f32.gmra.mrb[8].mxu1 %v400_v27 }
 0x449   :  { %v492_v31 = vpop.f32.mrb[6].mxu1 }
 0x44a   :  { %v493_v33 = vadd.f32 %v492_v31, %v420_v29  ;;  %v699_v34 = vpop.f32.mrb[7].mxu1 }
 0x44c   :  { %502 = vst [vmem:[#allocation10 + $0x8] sm:$0xff] %v493_v33 }
 0x44f   :  { %v487_v36 = vpop.f32.mrb[6].mxu0 }
 0x450   :  { %v488_v1 = vadd.f32 %v487_v36, %v420_v29  ;;  %v696_v26 = vpop.f32.mrb[7].mxu0 }
 0x451   :  { %v497_v37 = vpop.f32.mrb[8].mxu1 }
 0x452   :  { %501 = vst [vmem:[#allocation10] sm:$0xff] %v488_v1  ;;  %v498_v39 = vadd.f32 %v497_v37, %v420_v29  ;;  %v702_v28 = vpop.f32.mrb[9].mxu1 }
 0x454   :  { %503 = vst [vmem:[#allocation10 + $0x10] sm:$0xff] %v498_v39 }
 0x455   :  { %912 = shalt.err (!%p909_p8)
}
 0x456   :  { %s913_s22 = scalar_lea.hbm %s1184_s5, 384 }
 0x457   :  { %p914_p9 = scmp.ne.s32.totalorder %s1184_s5, %s913_s22  ;;  %p917_p10 = scmp.lt.u32.totalorder %s913_s22, %s1184_s5 }
 0x459   :  { %p919_p11 = pnand %p917_p10, %p914_p9 }
 0x45b   :  { %922 = shalt.err (!%p919_p11)
}
 0x45c   :  { %515 = dma.vmem_to_hbm [thread:$0]  %s510_s17, 384, %s1184_s5, [#allocation4], %s933_s30, %s933_s30, %s934_s6  }
 0x45d   :  { %929 = dma.done.wait [#allocation4], 384  }
 0x45e   :  { %930 = vsyncadd [#allocation4], 4294966912 }
 0x45f   :  { %519 = vsyncpa [#allocation3], 1 }
 0x460   :  { %520 = vsyncpa [#allocation6], 1 }
 0x461   :  { %521 = vsyncpa [#allocation9], 1 }
 0x462   :  { %522 = vsyncpa [#allocation4], 1 }

</bundles_post_ra>
